<compile_context>
chip_gen: v7x
topology: tpu7x:2x2x1
jax: 0.10.0
libtpu: 0.0.40
codegen_flags: <defaults>
</compile_context>

<pallas_src>
import functools

import jax
import jax.numpy as jnp
from jax.experimental import pallas as pl
from jax.experimental.pallas import tpu as pltpu


def _leaky(v):
    # LeakyReLU with negative slope 0.1 (f32 on the VPU).
    return jnp.where(v > 0, v, 0.1 * v)


def _residual_block_kernel(x_ref, w1_ref, b1_ref, w2_ref, b2_ref,
                           xcol_ref, yrow_ref, o_ref, *, H, W):
    """One grid step: a block of whole images in lane-dense (C, TP) layout."""
    TP = x_ref.shape[1]                       # Nb * H * W, multiple of 128

    x = x_ref[...]                            # (Cin, TP)  f32, lane-dense

    # ---- Stage 1: 1x1 conv == channel matmul (BN1 scale folded into w1).
    h = jnp.dot(w1_ref[...], x, preferred_element_type=jnp.float32)   # (Cmid, TP)
    h = _leaky(h + b1_ref[...])

    # ---- Stage 2: 3x3 conv (stride 1, padding 1) as ONE im2col matmul.
    # Shifted copies of h are built with lane rolls (register-resident, XLU);
    # positions whose 3x3 neighbour falls outside the image (top/bottom row,
    # left/right column, or across an image seam inside the block) are zeroed
    # with precomputed per-lane coordinate masks -> exact zero padding.
    xcol = xcol_ref[...]                      # (1, TP) int32: x coordinate of lane
    yrow = yrow_ref[...]                      # (1, TP) int32: y coordinate of lane
    x_ok = {-1: xcol >= 1, 0: None, 1: xcol <= W - 2}
    y_ok = {-1: yrow >= 1, 0: None, 1: yrow <= H - 2}

    patches = []
    for dy in (-1, 0, 1):                     # tap order = (ky, kx) row-major
        for dx in (-1, 0, 1):
            shift = dy * W + dx               # flat offset of the neighbour
            if shift == 0:
                patches.append(h)
                continue
            # rolled[:, p] == h[:, (p + shift) mod TP]; the lanes that wrapped
            # are exactly the ones the border mask zeroes out.
            rolled = pltpu.roll(h, (-shift) % TP, 1)
            mask = y_ok[dy]
            if x_ok[dx] is not None:
                mask = x_ok[dx] if mask is None else (mask & x_ok[dx])
            patches.append(jnp.where(mask, rolled, 0.0))

    col = jnp.concatenate(patches, axis=0)    # (9*Cmid, TP) im2col block

    y = jnp.dot(w2_ref[...], col, preferred_element_type=jnp.float32)  # (Cout, TP)
    y = _leaky(y + b2_ref[...])

    # ---- residual add (Cout == Cin), full-lane-width store.
    o_ref[...] = y + x


def residual_block(x_nchw, w1, bias1, w2, bias2, *, images_per_step=None):
    """ResidualBlock forward (inference-mode BN already folded into params).

    x_nchw: (N, Cin, H, W) f32                     (PyTorch NCHW layout)
    w1:     (Cmid, Cin)      1x1 conv weight, BN1 scale folded in
    bias1:  (Cmid, 1)        BN1 bias
    w2:     (Cout, 9*Cmid)   3x3 conv weight, tap-major ((ky*3+kx)*Cmid + c),
                             BN2 scale folded in
    bias2:  (Cout, 1)        BN2 bias
    """
    N, Cin, H, W = x_nchw.shape
    Cmid = w1.shape[0]
    Cout = w2.shape[0]
    assert Cout == Cin, "residual add requires out_channels == in_channels"

    HW = H * W
    Nb = N if images_per_step is None else images_per_step
    assert N % Nb == 0
    TP = Nb * HW
    assert TP % 128 == 0, "per-step lane width must be a multiple of 128"

    # Lane-dense layout: channels on sublanes, flattened (N, H, W) on lanes.
    xk = jnp.transpose(x_nchw, (1, 0, 2, 3)).reshape(Cin, N * HW)

    # Per-lane spatial coordinates (periodic per image, so one (1, TP) block
    # with a constant index_map serves every grid step and is DMA'd once).
    p = jnp.arange(TP, dtype=jnp.int32)
    xcol = (p % W).reshape(1, TP)
    yrow = ((p % HW) // W).reshape(1, TP)

    kernel = functools.partial(_residual_block_kernel, H=H, W=W)

    out = pl.pallas_call(
        kernel,
        out_shape=jax.ShapeDtypeStruct((Cout, N * HW), jnp.float32),
        grid_spec=pltpu.PrefetchScalarGridSpec(
            num_scalar_prefetch=0,
            grid=(N // Nb,),
            in_specs=[
                pl.BlockSpec((Cin, TP), lambda i: (0, i)),          # x block
                pl.BlockSpec((Cmid, Cin), lambda i: (0, 0)),        # w1
                pl.BlockSpec((Cmid, 1), lambda i: (0, 0)),          # bias1
                pl.BlockSpec((Cout, 9 * Cmid), lambda i: (0, 0)),   # w2 (im2col)
                pl.BlockSpec((Cout, 1), lambda i: (0, 0)),          # bias2
                pl.BlockSpec((1, TP), lambda i: (0, 0)),            # xcol
                pl.BlockSpec((1, TP), lambda i: (0, 0)),            # yrow
            ],
            out_specs=pl.BlockSpec((Cout, TP), lambda i: (0, i)),
        ),
        compiler_params=pltpu.CompilerParams(
            # Batch blocks are independent -> shard across TensorCores on v7x.
            dimension_semantics=("parallel",)),
    )(xk, w1, bias1, w2, bias2, xcol, yrow)

    return out.reshape(Cout, N, H, W).transpose(1, 0, 2, 3)


def fold_params(w1_oihw, g1, b1, m1, v1, w2_oihw, g2, b2, m2, v2, eps=1e-5):
    """Fold inference-mode BN into conv weights / per-channel bias (plain JAX)."""
    Cmid, Cin = w1_oihw.shape[0], w1_oihw.shape[1]
    Cout = w2_oihw.shape[0]
    scale1 = g1 / jnp.sqrt(v1 + eps)
    scale2 = g2 / jnp.sqrt(v2 + eps)
    w1k = w1_oihw.reshape(Cmid, Cin) * scale1[:, None]
    b1k = (b1 - m1 * scale1).reshape(Cmid, 1)
    # (Cout, Cmid, 3, 3) -> (Cout, ky, kx, Cmid) -> (Cout, 9*Cmid), tap-major.
    w2k = w2_oihw.transpose(0, 2, 3, 1).reshape(Cout, 9 * Cmid) * scale2[:, None]
    b2k = (b2 - m2 * scale2).reshape(Cout, 1)
    return w1k, b1k, w2k, b2k


def _reference(x, w1_oihw, g1, b1, m1, v1, w2_oihw, g2, b2, m2, v2, eps=1e-5):
    """Pure-JAX reference (inference-mode BN), NCHW like the PyTorch module."""
    dn = ('NCHW', 'OIHW', 'NCHW')

    def bn_lrelu(h, g, b, m, v):
        s = (g / jnp.sqrt(v + eps))[None, :, None, None]
        hn = (h - m[None, :, None, None]) * s + b[None, :, None, None]
        return jnp.where(hn > 0, hn, 0.1 * hn)

    h = jax.lax.conv_general_dilated(x, w1_oihw, (1, 1), 'VALID',
                                     dimension_numbers=dn,
                                     precision=jax.lax.Precision.HIGHEST)
    h = bn_lrelu(h, g1, b1, m1, v1)
    h = jax.lax.conv_general_dilated(h, w2_oihw, (1, 1), ((1, 1), (1, 1)),
                                     dimension_numbers=dn,
                                     precision=jax.lax.Precision.HIGHEST)
    h = bn_lrelu(h, g2, b2, m2, v2)
    return h + x


if __name__ == "__main__":
    N, H, W = 4, 16, 16
    Cin, Cmid, Cout = 4, 8, 4          # out == in required by the residual add
    eps = 1e-5

    key = jax.random.PRNGKey(0)
    ks = jax.random.split(key, 11)

    # deterministic synthetic parameters (Conv2d has bias=False in the module)
    x = jax.random.normal(ks[0], (N, Cin, H, W), jnp.float32)
    w1_oihw = 0.3 * jax.random.normal(ks[1], (Cmid, Cin, 1, 1), jnp.float32)
    w2_oihw = 0.1 * jax.random.normal(ks[2], (Cout, Cmid, 3, 3), jnp.float32)
    g1 = 0.5 + jax.random.uniform(ks[3], (Cmid,), jnp.float32)
    b1 = 0.1 * jax.random.normal(ks[4], (Cmid,), jnp.float32)
    m1 = 0.1 * jax.random.normal(ks[5], (Cmid,), jnp.float32)
    v1 = 0.5 + jax.random.uniform(ks[6], (Cmid,), jnp.float32)
    g2 = 0.5 + jax.random.uniform(ks[7], (Cout,), jnp.float32)
    b2 = 0.1 * jax.random.normal(ks[8], (Cout,), jnp.float32)
    m2 = 0.1 * jax.random.normal(ks[9], (Cout,), jnp.float32)
    v2 = 0.5 + jax.random.uniform(ks[10], (Cout,), jnp.float32)

    w1k, b1k, w2k, b2k = fold_params(w1_oihw, g1, b1, m1, v1,
                                     w2_oihw, g2, b2, m2, v2, eps)

    out = residual_block(x, w1k, b1k, w2k, b2k, images_per_step=2)
    out = jax.block_until_ready(out)

    ref = _reference(x, w1_oihw, g1, b1, m1, v1, w2_oihw, g2, b2, m2, v2, eps)
    assert out.shape == (N, Cout, H, W)
    max_err = float(jnp.max(jnp.abs(out - ref)))
    assert jnp.allclose(out, ref, rtol=2e-2, atol=2e-2), max_err

    print("KERNEL_OK")
</pallas_src>

<mosaic_0001>
module attributes {stable_mosaic.version = 11 : i64} {
  func.func @_residual_block_kernel(%arg0: i32, %arg1: memref<4x512xf32, #tpu.memory_space<vmem>>, %arg2: memref<8x4xf32, #tpu.memory_space<vmem>>, %arg3: memref<8x1xf32, #tpu.memory_space<vmem>>, %arg4: memref<4x72xf32, #tpu.memory_space<vmem>>, %arg5: memref<4x1xf32, #tpu.memory_space<vmem>>, %arg6: memref<1x512xi32, #tpu.memory_space<vmem>>, %arg7: memref<1x512xi32, #tpu.memory_space<vmem>>, %arg8: memref<4x512xf32, #tpu.memory_space<vmem>>) attributes {dimension_semantics = [#tpu.dimension_semantics<parallel>], iteration_bounds = array<i64: 2>, scalar_prefetch = 0 : i64, scratch_operands = 0 : i64, tpu.core_type = #tpu.core_type<tc>, window_params = [{transform_indices = @transform_0, window_bounds = array<i64: 4, 512>}, {pipeline_mode = #tpu.pipeline_mode<synchronous>, transform_indices = @transform_1, window_bounds = array<i64: 8, 4>}, {pipeline_mode = #tpu.pipeline_mode<synchronous>, transform_indices = @transform_2, window_bounds = array<i64: 8, 1>}, {pipeline_mode = #tpu.pipeline_mode<synchronous>, transform_indices = @transform_3, window_bounds = array<i64: 4, 72>}, {pipeline_mode = #tpu.pipeline_mode<synchronous>, transform_indices = @transform_4, window_bounds = array<i64: 4, 1>}, {pipeline_mode = #tpu.pipeline_mode<synchronous>, transform_indices = @transform_5, window_bounds = array<i64: 1, 512>}, {pipeline_mode = #tpu.pipeline_mode<synchronous>, transform_indices = @transform_6, window_bounds = array<i64: 1, 512>}, {transform_indices = @transform_7, window_bounds = array<i64: 4, 512>}]} {
    %c0 = arith.constant 0 : index
    %c0_0 = arith.constant 0 : index
    %0 = vector.load %arg1[%c0, %c0_0] : memref<4x512xf32, #tpu.memory_space<vmem>>, vector<4x512xf32>
    %c0_1 = arith.constant 0 : index
    %c0_2 = arith.constant 0 : index
    %1 = vector.load %arg2[%c0_1, %c0_2] : memref<8x4xf32, #tpu.memory_space<vmem>>, vector<8x4xf32>
    %cst = arith.constant dense<0.000000e+00> : vector<8x512xf32>
    %2 = tpu.matmul %1, %0, %cst {dimension_numbers = #tpu.dot_dimension_numbers<[1], [0], [0], [1], [0, 0, 1, 1], [], []>} : vector<8x4xf32>, vector<4x512xf32>, vector<8x512xf32> -> vector<8x512xf32>
    %c0_3 = arith.constant 0 : index
    %c0_4 = arith.constant 0 : index
    %3 = vector.load %arg3[%c0_3, %c0_4] : memref<8x1xf32, #tpu.memory_space<vmem>>, vector<8x1xf32>
    %4 = vector.broadcast %3 : vector<8x1xf32> to vector<8x512xf32>
    %5 = arith.addf %2, %4 : vector<8x512xf32>
    %cst_5 = arith.constant 0.000000e+00 : f32
    %6 = vector.broadcast %cst_5 : f32 to vector<8x512xf32>
    %7 = arith.cmpf ogt, %5, %6 : vector<8x512xf32>
    %cst_6 = arith.constant 1.000000e-01 : f32
    %8 = vector.broadcast %cst_6 : f32 to vector<8x512xf32>
    %9 = arith.mulf %8, %5 : vector<8x512xf32>
    %10 = arith.select %7, %5, %9 : vector<8x512xi1>, vector<8x512xf32>
    %c0_7 = arith.constant 0 : index
    %c0_8 = arith.constant 0 : index
    %11 = vector.load %arg6[%c0_7, %c0_8] : memref<1x512xi32, #tpu.memory_space<vmem>>, vector<1x512xi32>
    %c0_9 = arith.constant 0 : index
    %c0_10 = arith.constant 0 : index
    %12 = vector.load %arg7[%c0_9, %c0_10] : memref<1x512xi32, #tpu.memory_space<vmem>>, vector<1x512xi32>
    %c1_i32 = arith.constant 1 : i32
    %13 = vector.broadcast %c1_i32 : i32 to vector<1x512xi32>
    %14 = arith.cmpi sge, %11, %13 : vector<1x512xi32>
    %c14_i32 = arith.constant 14 : i32
    %15 = vector.broadcast %c14_i32 : i32 to vector<1x512xi32>
    %16 = arith.cmpi sle, %11, %15 : vector<1x512xi32>
    %c1_i32_11 = arith.constant 1 : i32
    %17 = vector.broadcast %c1_i32_11 : i32 to vector<1x512xi32>
    %18 = arith.cmpi sge, %12, %17 : vector<1x512xi32>
    %c14_i32_12 = arith.constant 14 : i32
    %19 = vector.broadcast %c14_i32_12 : i32 to vector<1x512xi32>
    %20 = arith.cmpi sle, %12, %19 : vector<1x512xi32>
    %c17_i32 = arith.constant 17 : i32
    %21 = tpu.dynamic_rotate %10 by %c17_i32 dim 1 : vector<8x512xf32>, i32 -> vector<8x512xf32>
    %22 = arith.andi %18, %14 : vector<1x512xi1>
    %cst_13 = arith.constant 0.000000e+00 : f32
    %23 = vector.shape_cast %22 : vector<1x512xi1> to vector<1x512xi1>
    %24 = vector.broadcast %23 : vector<1x512xi1> to vector<8x512xi1>
    %25 = vector.broadcast %cst_13 : f32 to vector<8x512xf32>
    %26 = arith.select %24, %21, %25 : vector<8x512xi1>, vector<8x512xf32>
    %c16_i32 = arith.constant 16 : i32
    %27 = tpu.dynamic_rotate %10 by %c16_i32 dim 1 : vector<8x512xf32>, i32 -> vector<8x512xf32>
    %cst_14 = arith.constant 0.000000e+00 : f32
    %28 = vector.shape_cast %18 : vector<1x512xi1> to vector<1x512xi1>
    %29 = vector.broadcast %28 : vector<1x512xi1> to vector<8x512xi1>
    %30 = vector.broadcast %cst_14 : f32 to vector<8x512xf32>
    %31 = arith.select %29, %27, %30 : vector<8x512xi1>, vector<8x512xf32>
    %c15_i32 = arith.constant 15 : i32
    %32 = tpu.dynamic_rotate %10 by %c15_i32 dim 1 : vector<8x512xf32>, i32 -> vector<8x512xf32>
    %33 = arith.andi %18, %16 : vector<1x512xi1>
    %cst_15 = arith.constant 0.000000e+00 : f32
    %34 = vector.shape_cast %33 : vector<1x512xi1> to vector<1x512xi1>
    %35 = vector.broadcast %34 : vector<1x512xi1> to vector<8x512xi1>
    %36 = vector.broadcast %cst_15 : f32 to vector<8x512xf32>
    %37 = arith.select %35, %32, %36 : vector<8x512xi1>, vector<8x512xf32>
    %c1_i32_16 = arith.constant 1 : i32
    %38 = tpu.dynamic_rotate %10 by %c1_i32_16 dim 1 : vector<8x512xf32>, i32 -> vector<8x512xf32>
    %cst_17 = arith.constant 0.000000e+00 : f32
    %39 = vector.shape_cast %14 : vector<1x512xi1> to vector<1x512xi1>
    %40 = vector.broadcast %39 : vector<1x512xi1> to vector<8x512xi1>
    %41 = vector.broadcast %cst_17 : f32 to vector<8x512xf32>
    %42 = arith.select %40, %38, %41 : vector<8x512xi1>, vector<8x512xf32>
    %c511_i32 = arith.constant 511 : i32
    %43 = tpu.dynamic_rotate %10 by %c511_i32 dim 1 : vector<8x512xf32>, i32 -> vector<8x512xf32>
    %cst_18 = arith.constant 0.000000e+00 : f32
    %44 = vector.shape_cast %16 : vector<1x512xi1> to vector<1x512xi1>
    %45 = vector.broadcast %44 : vector<1x512xi1> to vector<8x512xi1>
    %46 = vector.broadcast %cst_18 : f32 to vector<8x512xf32>
    %47 = arith.select %45, %43, %46 : vector<8x512xi1>, vector<8x512xf32>
    %c497_i32 = arith.constant 497 : i32
    %48 = tpu.dynamic_rotate %10 by %c497_i32 dim 1 : vector<8x512xf32>, i32 -> vector<8x512xf32>
    %49 = arith.andi %20, %14 : vector<1x512xi1>
    %cst_19 = arith.constant 0.000000e+00 : f32
    %50 = vector.shape_cast %49 : vector<1x512xi1> to vector<1x512xi1>
    %51 = vector.broadcast %50 : vector<1x512xi1> to vector<8x512xi1>
    %52 = vector.broadcast %cst_19 : f32 to vector<8x512xf32>
    %53 = arith.select %51, %48, %52 : vector<8x512xi1>, vector<8x512xf32>
    %c496_i32 = arith.constant 496 : i32
    %54 = tpu.dynamic_rotate %10 by %c496_i32 dim 1 : vector<8x512xf32>, i32 -> vector<8x512xf32>
    %cst_20 = arith.constant 0.000000e+00 : f32
    %55 = vector.shape_cast %20 : vector<1x512xi1> to vector<1x512xi1>
    %56 = vector.broadcast %55 : vector<1x512xi1> to vector<8x512xi1>
    %57 = vector.broadcast %cst_20 : f32 to vector<8x512xf32>
    %58 = arith.select %56, %54, %57 : vector<8x512xi1>, vector<8x512xf32>
    %c495_i32 = arith.constant 495 : i32
    %59 = tpu.dynamic_rotate %10 by %c495_i32 dim 1 : vector<8x512xf32>, i32 -> vector<8x512xf32>
    %60 = arith.andi %20, %16 : vector<1x512xi1>
    %cst_21 = arith.constant 0.000000e+00 : f32
    %61 = vector.shape_cast %60 : vector<1x512xi1> to vector<1x512xi1>
    %62 = vector.broadcast %61 : vector<1x512xi1> to vector<8x512xi1>
    %63 = vector.broadcast %cst_21 : f32 to vector<8x512xf32>
    %64 = arith.select %62, %59, %63 : vector<8x512xi1>, vector<8x512xf32>
    %65 = tpu.concatenate %26, %31, %37, %42, %10, %47, %53, %58, %64 in 0 : vector<8x512xf32>, vector<8x512xf32>, vector<8x512xf32>, vector<8x512xf32>, vector<8x512xf32>, vector<8x512xf32>, vector<8x512xf32>, vector<8x512xf32>, vector<8x512xf32> -> vector<72x512xf32>
    %c0_22 = arith.constant 0 : index
    %c0_23 = arith.constant 0 : index
    %66 = vector.load %arg4[%c0_22, %c0_23] : memref<4x72xf32, #tpu.memory_space<vmem>>, vector<4x72xf32>
    %cst_24 = arith.constant dense<0.000000e+00> : vector<4x512xf32>
    %67 = tpu.matmul %66, %65, %cst_24 {dimension_numbers = #tpu.dot_dimension_numbers<[1], [0], [0], [1], [0, 0, 1, 1], [], []>} : vector<4x72xf32>, vector<72x512xf32>, vector<4x512xf32> -> vector<4x512xf32>
    %c0_25 = arith.constant 0 : index
    %c0_26 = arith.constant 0 : index
    %68 = vector.load %arg5[%c0_25, %c0_26] : memref<4x1xf32, #tpu.memory_space<vmem>>, vector<4x1xf32>
    %69 = vector.broadcast %68 : vector<4x1xf32> to vector<4x512xf32>
    %70 = arith.addf %67, %69 : vector<4x512xf32>
    %cst_27 = arith.constant 0.000000e+00 : f32
    %71 = vector.broadcast %cst_27 : f32 to vector<4x512xf32>
    %72 = arith.cmpf ogt, %70, %71 : vector<4x512xf32>
    %cst_28 = arith.constant 1.000000e-01 : f32
    %73 = vector.broadcast %cst_28 : f32 to vector<4x512xf32>
    %74 = arith.mulf %73, %70 : vector<4x512xf32>
    %75 = arith.select %72, %70, %74 : vector<4x512xi1>, vector<4x512xf32>
    %76 = arith.addf %75, %0 : vector<4x512xf32>
    %c0_29 = arith.constant 0 : index
    %c0_30 = arith.constant 0 : index
    %77 = vector.load %arg8[%c0_29, %c0_30] : memref<4x512xf32, #tpu.memory_space<vmem>>, vector<4x512xf32>
    tpu.vector_store %arg8[%c0_29, %c0_30], %76 {strides = array<i32>} : memref<4x512xf32, #tpu.memory_space<vmem>>, vector<4x512xf32>,
    return
  }
  func.func @transform_0(%arg0: i32) -> (i32, i32) {
    %c0_i32 = arith.constant 0 : i32
    %c0_i32_0 = arith.constant 0 : i32
    return %c0_i32, %arg0 : i32, i32
  }
  func.func @transform_1(%arg0: i32) -> (i32, i32) {
    %c0_i32 = arith.constant 0 : i32
    %c0_i32_0 = arith.constant 0 : i32
    %c0_i32_1 = arith.constant 0 : i32
    return %c0_i32, %c0_i32_0 : i32, i32
  }
  func.func @transform_2(%arg0: i32) -> (i32, i32) {
    %c0_i32 = arith.constant 0 : i32
    %c0_i32_0 = arith.constant 0 : i32
    %c0_i32_1 = arith.constant 0 : i32
    return %c0_i32, %c0_i32_0 : i32, i32
  }
  func.func @transform_3(%arg0: i32) -> (i32, i32) {
    %c0_i32 = arith.constant 0 : i32
    %c0_i32_0 = arith.constant 0 : i32
    %c0_i32_1 = arith.constant 0 : i32
    return %c0_i32, %c0_i32_0 : i32, i32
  }
  func.func @transform_4(%arg0: i32) -> (i32, i32) {
    %c0_i32 = arith.constant 0 : i32
    %c0_i32_0 = arith.constant 0 : i32
    %c0_i32_1 = arith.constant 0 : i32
    return %c0_i32, %c0_i32_0 : i32, i32
  }
  func.func @transform_5(%arg0: i32) -> (i32, i32) {
    %c0_i32 = arith.constant 0 : i32
    %c0_i32_0 = arith.constant 0 : i32
    %c0_i32_1 = arith.constant 0 : i32
    return %c0_i32, %c0_i32_0 : i32, i32
  }
  func.func @transform_6(%arg0: i32) -> (i32, i32) {
    %c0_i32 = arith.constant 0 : i32
    %c0_i32_0 = arith.constant 0 : i32
    %c0_i32_1 = arith.constant 0 : i32
    return %c0_i32, %c0_i32_0 : i32, i32
  }
  func.func @transform_7(%arg0: i32) -> (i32, i32) {
    %c0_i32 = arith.constant 0 : i32
    %c0_i32_0 = arith.constant 0 : i32
    return %c0_i32, %arg0 : i32, i32
  }
}

</mosaic_0001>

<bundles_post_ra>
// kernel: tpu_custom_call.1
= control target key start
LH: loop header
LB: loop body
LE: loop exit
PB: predicated region body
PF: predicated region fallthrough
CT: control target
= control target key end

     0   :  { %12 = vsyncpa [#allocation3], 0  ;;  %s2068_s0 = inlined_call_operand.hbm [shape: f32[4,1024], index: 0, kind: input, shape index: {}]   ;;  %s2069_s1 = inlined_call_operand.vmem [shape: f32[8,4], index: 1, kind: input, shape index: {}]   ;;  %s2070_s2 = inlined_call_operand.vmem [shape: f32[8,1], index: 2, kind: input, shape index: {}]   ;;  %s2071_s3 = inlined_call_operand.vmem [shape: f32[4,72], index: 3, kind: input, shape index: {}]   ;;  %s2072_s4 = inlined_call_operand.vmem [shape: f32[4,1], index: 4, kind: input, shape index: {}]   ;;  %s2073_s5 = inlined_call_operand.vmem [shape: s32[1,512], index: 5, kind: input, shape index: {}]   ;;  %s2074_s6 = inlined_call_operand.vmem [shape: s32[1,512], index: 6, kind: input, shape index: {}]   ;;  %s2075_s7 = inlined_call_operand.hbm [shape: f32[4,1024], index: 7, kind: output, shape index: {}]  }
   0x1   :  { %14 = vsyncpa [#allocation3 + $0x1], 0 }
   0x2   :  { %15 = vsyncpa [#allocation4], 0 }
   0x3   :  { %17 = vsyncpa [#allocation4 + $0x1], 0  ;;  %s1445_s24 = smov 0   ;;  %s1447_s25 = smov 0  }
   0x4   :  { %s1449_s26 = smov 0   ;;  %s1451_s27 = smov 0  }
   0x5 LB: > { %s1466_s28 = sadd.s32 4294967295, %s1390_s27   ;;  %s1059_s29 = sadd.s32 4294967294, %s1390_s27   ;;  %s1390_s27 = sphi %s1451_s27, %s2210_s27   ;;  %s1386_s26 = sphi %s1449_s26, %s2209_s26   ;;  %s1382_s25 = sphi %s1447_s25, %s2208_s25   ;;  %s1378_s24 = sphi %s1445_s24, %s2207_s24  }
   0x6   : > { %s1470_s30 = sadd.s32 1, %s1390_s27   ;;  %s30_s8 = sadd.s32 1, %s1386_s26 }
   0x7   : > { %s27_s9 = ssub.s32 %s1390_s27, %s1470_s30  ;;  %p37_p0 = scmp.ne.s32.totalorder %s1386_s26, %s1382_s25 }
   0x8   : > { %p28_p1 = scmp.eq.s32.totalorder %s27_s9, 0  ;;  %p38_p2 = scmp.eq.s32.totalorder %s1390_s27, 0 }
   0x9   : > { %p43_p3 = scmp.ne.s32.totalorder %s1382_s25, %s1378_s24  ;;  %p44_p4 = scmp.eq.s32.totalorder %s1466_s28, 0 }
   0xa   : > { %s1482_s10 = scalar_select %p28_p1, %s1386_s26, %s30_s8  }
   0xb   : > { %p1484_p5 = por %p38_p2, %p37_p0  ;;  %p1488_p6 = por %p44_p4, %p43_p3 }
   0xc   : > { %p193_p7 = scmp.eq.s32.totalorder %s1466_s28, 1  ;;  %p199_p8 = scmp.eq.s32.totalorder %s1059_s29, 1 }
   0xd   : > { %p1175_p10 = scmp.lt.s32.totalorder %s1390_s27, 2  ;;  %s237_s15 = sand.u32 1, %s1386_s26  }
   0xe   : > { %p1495_p11 = por %p193_p7, %p37_p0  ;;  %p1499_p12 = por %p199_p8, %p43_p3 }
   0xf   : > { %s1113_s16 = sshll.u32 %s1390_s27, 8  ;;  %s1062_s17 = sshll.u32 %s237_s15, 4 }
  0x10   : > { %s2089_s13 = scalar_select %p1495_p11, 1, 0 }
  0x11   : > { %s2090_s14 = scalar_select %p1499_p12, 1, 0 }
  0x12   : > { %s1508_s20 = scalar_lea.hbm %s2068_s0, %s1113_s16  ;;  %s241_s21 = scalar_lea.vmem [#allocation2], %s1062_s17 }
  0x13   : > { %s249_s22 = sshll.u32 %s241_s21, 4  ;;  %p1512_p13 = pnand %p1175_p10, %p1484_p5  ;;  %s1516_s22 = int_to_ptr.vmem [resolvable:$true] %s249_s22 }
  0x14   : > { %s238_s29 = scalar_lea.sflag [#allocation3], %s237_s15  ;;  %s1294_s8 = scalar_lea.hbm %s1508_s20, 256 }
  0x15   : > { %p1295_p2 = scmp.ne.s32.totalorder %s1508_s20, %s1294_s8  ;;  %p1296_p3 = pneg %p1512_p13 }
  0x16   : > { %s1299_s16 = scalar_lea.hbm %s2068_s0, 512  ;;  %p1300_p5 = scmp.lt.u32.totalorder %s1508_s20, %s2068_s0 }
  0x17   : > { %p1297_p4 = pnand %p1296_p3, %p1295_p2  ;;  %p1301_p8 = scmp.lt.u32.totalorder %s1299_s16, %s1294_s8 }
  0x18   : > { %p1303_p9 = scmp.lt.u32.totalorder %s1294_s8, %s1508_s20 }
  0x19   : > { %p1298_p7 = pneg %p1297_p4  ;;  %p1302_p10 = por %p1301_p8, %p1300_p5 }
  0x1b   : > { %p1304_p0 = por %p1303_p9, %p1302_p10 }
  0x1d   : > { %p1305_p1 = pnand %p1304_p0, %p1298_p7 }
  0x1f   : > { %1308 = shalt.err (!%p1305_p1)
}
  0x20   : > { %s1309_s15 = scalar_lea.vmem %s1516_s22, 256  ;;  %s1392_s19 = smov [#allocation2]  }
  0x21   : > { %p1310_p2 = scmp.ne.s32.totalorder %s1516_s22, %s1309_s15  ;;  %s1314_s21 = sshll.u32 %s1392_s19, 4  ;;  %s1315_s21 = int_to_ptr.vmem [resolvable:$false] %s1314_s21 }
  0x22   : > { %s1316_s9 = scalar_lea.vmem %s1315_s21, 512  ;;  %p1317_p11 = scmp.lt.s32.totalorder %s1516_s22, %s1315_s21 }
  0x23   : > { %p1312_p4 = pnand %p1310_p2, %p1296_p3  ;;  %p1318_p5 = scmp.lt.s32.totalorder %s1316_s9, %s1309_s15 }
  0x25   : > { %p1313_p12 = pneg %p1312_p4  ;;  %p1319_p8 = por %p1318_p5, %p1317_p11 }
  0x27   : > { %p1320_p9 = pnand %p1319_p8, %p1313_p12 }
  0x29   : > { %1323 = shalt.err (!%p1320_p9)
}
  0x2a   : > { %1170 = dma.hbm_to_vmem [thread:$0]  (!%p1512_p13), %s1508_s20, 256, %s1516_s22, %s238_s29  }
  0x2b   : > { %p2092_p0 = scmp.lt.s32.totalorder %s1390_s27, 3  ;;  %p2093_p1 = scmp.ge.s32.totalorder %s1390_s27, 1 }
  0x2d   : > { %p255_p3 = pnand %p2093_p1, %p2092_p0 }
  0x2e   : > { %s1550_s8 = sand.u32 (!%p255_p3), 1, %s1382_s25  }
  0x2f   : > { %258 = sbr.rel (%p255_p3) target bundleno = 676 (0x2a4), region = 48  ;;  %s1066_s11 = sshll.u32 (!%p255_p3), %s1550_s8, 4 }
  0x30   : > { %s261_s16 = scalar_lea.sflag (!%p255_p3), [#allocation3], %s1550_s8  ;;  %s264_s23 = scalar_lea.vmem (!%p255_p3), [#allocation2], %s1066_s11 }
  0x36   : > { %1369 = dma.done.wait (%p1488_p6), %s261_s16, 256  }
  0x37   : > { %1371 = vsyncadd (%p1488_p6), %s261_s16, 4294967040  ;;  %v1393_v0 = vmov 0.0   ;;  %v1394_v1 = vmov 0   ;;  %v1562_v2 = vld [vmem:[%s264_s23] sm:$0xff]  ;;  %vm314_vm0 = vcmask 1043456   ;;  %v1564_v3 = vld [vmem:[%s264_s23 + $0x8] sm:$0xff]  ;;  %v491_v30 = vlaneseq }
  0x38   : > { %387 = vmatprep.mubr.f32.mxu0 %v1393_v0  ;;  %458 = vmatprep.mubr.f32.mxu1 %v1393_v0  ;;  %v1568_v4 = vcombine.high %v1562_v2, %v1562_v2  ;;  %v1572_v5 = vcombine.high %v1564_v3, %v1564_v3  ;;  %v300_v6 = vld [vmem:[%s2070_s2] sm:$0xff]  ;;  %vm310_vm1 = vcmask 31744   ;;  %s1395_s17 = smov 17   ;;  %s1396_s18 = smov 16   ;;  %v2145_v50 = vmov 0 }
  0x39   : > { %1220 = vset.pattern.permute.xlu0 %v1394_v1  ;;  %1291 = vset.pattern.permute.xlu1 %v1394_v1  ;;  %v299_v7 = vld [vmem:[%s2069_s1] sm:$0xff]  ;;  %s1397_s15 = smov 15   ;;  %s1398_s19 = smov 1   ;;  %v501_v31 = vshrl.u32 %v491_v30, 7  ;;  %v1626_v37 = vand.u32 127, %v491_v30 }
  0x3a   : > { %303 = vperm.xlu0 %1220, %v300_v6   ;;  %1068 = vmatprep.subr.msk.mxu0 %vm314_vm0, %v1568_v4  ;;  %s1399_s21 = smov 127   ;;  %s1400_s9 = smov 113   ;;  %v794_v27 = vld [vmem:[%s2072_s4] sm:$0xf] }
  0x3b   : > { %1071 = vmatprep.subr.msk.mxu1 %vm314_vm0, %v1572_v5  ;;  %1069 = vmatpush1.msk.msra.mxu0 %vm314_vm0, %v1562_v2  ;;  %s1401_s16 = smov 112   ;;  %s1402_s23 = smov 111   ;;  %v1606_v28 = vld [vmem:[%s2073_s5] sm:$0xf]  ;;  %v1617_v32 = vsub.s32 1, %v501_v31  ;;  %v1620_v34 = vsub.s32 3, %v501_v31 }
  0x3c   : > { %1072 = vmatpush1.msk.msra.mxu1 %vm314_vm0, %v1564_v3  ;;  %1070 = vmatmul.mubr.msk.f32.vlgmr.msra.gmra.mrb[0].mxu0 %vm310_vm1, %v299_v7  ;;  %v1611_v29 = vld [vmem:[%s2074_s6] sm:$0xf]  ;;  %vm2078_vm6 = vcmp.ge.s32.totalorder %v1606_v28, 1  ;;  %vm2077_vm9 = vcmp.le.s32.totalorder %v1606_v28, 14  ;;  %v1624_v36 = vsub.s32 0, %v501_v31  ;;  %v1629_v39 = vsub.s32 2, %v501_v31 }
  0x3d   : > { %1073 = vmatmul.mubr.msk.f32.vlgmr.msra.gmra.mrb[0].mxu1 %vm310_vm1, %v299_v7  ;;  %868 = vmatprep.mubr.f32.mxu0 %v1393_v0  ;;  %vm481_vm7 = vcmp.ge.s32.totalorder %v1611_v29, 1  ;;  %v614_v44 = vsel %vm2078_vm6, 1, %v1394_v1  ;;  %v652_v63 = vsel %vm2077_vm9, 1, %v1394_v1  ;;  %p2204_p11 = scmp.ne.s32.totalorder %s2089_s13, 0  ;;  %s1404_s22 = smov [#allocation5]  }
  0x3e   : > { %939 = vmatprep.mubr.f32.mxu1 %v1393_v0  ;;  %vm498_vm8 = vmand %vm481_vm7, %vm2078_vm6  ;;  %v537_v35 = vsel %vm481_vm7, 1, %v1394_v1  ;;  %v622_v53 = vrot.slane %v614_v44, %v1617_v32  ;;  %v630_v57 = vrot.slane %v614_v44, %v1620_v34  ;;  %v618_v62 = vrot.slane %v614_v44, %v1624_v36  ;;  %s1328_s29 = sshll.u32 %s1404_s22, 4  ;;  %s1329_s29 = int_to_ptr.vmem [resolvable:$false] %s1328_s29 }
  0x3f   : > { %v499_v33 = vsel %vm498_vm8, 1, %v1394_v1  ;;  %vm575_vm10 = vmand %vm481_vm7, %vm2077_vm9  ;;  %v545_v40 = vrot.slane %v537_v35, %v1617_v32  ;;  %v553_v42 = vrot.slane %v537_v35, %v1620_v34  ;;  %v541_v45 = vrot.slane %v537_v35, %v1624_v36 }
  0x40   : > { %v507_v38 = vrot.slane %v499_v33, %v1617_v32  ;;  %v515_v41 = vrot.slane %v499_v33, %v1620_v34  ;;  %v503_v43 = vrot.slane %v499_v33, %v1624_v36  ;;  %v1643_v46 = vsel %vm575_vm10, 1, %v1394_v1 }
  0x41   : > { %v511_v48 = vrot.slane %v499_v33, %v1629_v39  ;;  %v549_v49 = vrot.slane %v537_v35, %v1629_v39  ;;  %vm1652_vm14 = vcmp.eq.s32.totalorder %v545_v40, 1  ;;  %vm1660_vm0 = vcmp.eq.s32.totalorder %v553_v42, 1 }
  0x42   : > { %vm1646_vm13 = vcmp.eq.s32.totalorder %v507_v38, 1  ;;  %vm1656_vm15 = vcmp.eq.s32.totalorder %v515_v41, 1  ;;  %vm1665_vm1 = vcmp.eq.s32.totalorder %v503_v43, 1  ;;  %v584_v55 = vrot.slane %v1643_v46, %v1617_v32 }
  0x43   : > { %v592_v56 = vrot.slane %v1643_v46, %v1620_v34  ;;  %v580_v61 = vrot.slane %v1643_v46, %v1624_v36  ;;  %v626_v7 = vrot.slane %v614_v44, %v1629_v39  ;;  %vm1694_vm7 = vcmp.eq.s32.totalorder %v622_v53, 1 }
  0x44   : > { %vm1699_vm10 = vcmp.eq.s32.totalorder %v584_v55, 1  ;;  %vm1707_vm12 = vcmp.eq.s32.totalorder %v630_v57, 1  ;;  %vm1719_vm11 = vcmp.eq.s32.totalorder %v618_v62, 1  ;;  %v664_v30 = vrot.slane %v652_v63, %v1629_v39 }
  0x45   : > { %vm1703_vm9 = vcmp.eq.s32.totalorder %v592_v56, 1  ;;  %vm1715_vm6 = vcmp.eq.s32.totalorder %v580_v61, 1  ;;  %v2122_v41 = vmov 0  ;;  %vm2129_vm8 = vcmp.le.s32.totalorder %v1611_v29, 14 }
  0xb9   : > { %v304_v8 = vpop.permute.xlu0 %303 }
 0x10f   : > { %v389_v9 = vpop.f32.mrb[0].mxu0 }
 0x110   : > { %v460_v10 = vpop.f32.mrb[0].mxu1  ;;  %v390_v11 = vadd.f32 %v389_v9, %v304_v8  ;;  %v391_v13 = vpop.f32.mrb[1].mxu0 }
 0x111   : > { %v461_v12 = vadd.f32 %v460_v10, %v304_v8  ;;  %v462_v14 = vpop.f32.mrb[1].mxu1  ;;  %v392_v15 = vadd.f32 %v391_v13, %v304_v8  ;;  %v2112_v13 = vmov 0 }
 0x112   : > { %v463_v16 = vadd.f32 %v462_v14, %v304_v8  ;;  %vm465_vm2 = vcmp.gt.f32.partialorder %v390_v11, 0.0  ;;  %v469_v17 = vmul.f32 0.1, %v390_v11  ;;  %v2113_v13 = vsel %vm1699_vm10, 4294967295, %v2112_v13 }
 0x113   : > { %vm467_vm3 = vcmp.gt.f32.partialorder %v461_v12, 0.0  ;;  %v471_v18 = vmul.f32 0.1, %v461_v12  ;;  %vm466_vm4 = vcmp.gt.f32.partialorder %v392_v15, 0.0  ;;  %v470_v19 = vmul.f32 0.1, %v392_v15 }
 0x114   : > { %vm468_vm5 = vcmp.gt.f32.partialorder %v463_v16, 0.0  ;;  %v472_v20 = vmul.f32 0.1, %v463_v16  ;;  %v1584_v21 = vsel %vm465_vm2, %v390_v11, %v469_v17  ;;  %vm1674_vm2 = vcmp.eq.s32.totalorder %v541_v45, 1 }
 0x115   : > { %v1586_v22 = vsel %vm467_vm3, %v461_v12, %v471_v18  ;;  %v1588_v23 = vsel %vm466_vm4, %v392_v15, %v470_v19  ;;  %vm1684_vm3 = vcmp.eq.s32.totalorder %v511_v48, 1  ;;  %vm1688_vm4 = vcmp.eq.s32.totalorder %v549_v49, 1 }
 0x116   : > { %v1590_v24 = vsel %vm468_vm5, %v463_v16, %v472_v20  ;;  %v1221_v26 = vpack.i.bf16 %v1588_v23, %v1584_v21  ;;  %vm2082_vm5 = vcmp.le.s32.totalorder %v1611_v29, 14  ;;  %v2110_v12 = vmov 0 }
 0x117   : > { %v1226_v25 = vpack.i.bf16 %v1590_v24, %v1586_v22  ;;  %v2111_v12 = vsel %vm1694_vm7, 4294967295, %v2110_v12  ;;  %v2114_v14 = vmov 0  ;;  %v2116_v15 = vmov 0 }
 0x118   : > { %1222 = vrot.lane.b32.xlu0 %v1221_v26, %s1395_s17  ;;  %v2115_v14 = vsel %vm1703_vm9, 4294967295, %v2114_v14  ;;  %v2117_v15 = vsel %vm1707_vm12, 4294967295, %v2116_v15  ;;  %v588_v16 = vrot.slane %v1643_v46, %v1629_v39  ;;  %v660_v17 = vrot.slane %v652_v63, %v1617_v32 }
 0x119   : > { %1227 = vrot.lane.b32.xlu1 %v1226_v25, %s1395_s17  ;;  %v2118_v20 = vmov 0  ;;  %v1729_v31 = vsel %vm2082_vm5, 1, %v1394_v1  ;;  %vm2128_vm7 = vcmp.ge.s32.totalorder %v1606_v28, 1  ;;  %s1330_s17 = scalar_lea.vmem %s1329_s29, 512 }
 0x11a   : > { %v2119_v20 = vsel %vm1715_vm6, 4294967295, %v2118_v20  ;;  %vm2124_vm6 = vcmp.lt.s32.totalorder %v1626_v37, 17  ;;  %vm1751_vm10 = vmand %vm2129_vm8, %vm2128_vm7  ;;  %v737_v47 = vrot.slane %v1729_v31, %v1617_v32  ;;  %vm2155_vm7 = vcmp.lt.s32.totalorder %v1626_v37, 1 }
 0x11b   : > { %vm2125_vm12 = vmmov %vm2124_vm6  ;;  %v1787_v54 = vsel %vm1751_vm10, 1, %v1394_v1 }
 0x11c   : > { %1237 = vrot.lane.b32.xlu0 %v1226_v25, %s1396_s18  ;;  %vm2126_vm5 = vmmov %vm2124_vm6 }
 0x11d   : > { %1232 = vrot.lane.b32.xlu1 %v1221_v26, %s1396_s18  ;;  %vm2127_vm9 = vmmov %vm2126_vm5 }
 0x11e   : > { %vm1143_vm8 = vmpackc.low %vm1688_vm4, %vm1684_vm3  ;;  %vm1807_vm4 = vcmp.eq.s32.totalorder %v664_v30, 1 }
 0x11f   : > { %v2146_v50 = vsel %vm1807_vm4, 4294967295, %v2145_v50 }
 0x120   : > { %1247 = vrot.lane.b32.xlu0 %v1226_v25, %s1397_s15 }
 0x121   : > { %1242 = vrot.lane.b32.xlu1 %v1221_v26, %s1397_s15 }
 0x124   : > { %1257 = vrot.lane.b32.xlu0 %v1226_v25, %s1398_s19 }
 0x125   : > { %1252 = vrot.lane.b32.xlu1 %v1221_v26, %s1398_s19 }
 0x128   : > { %1267 = vrot.lane.b32.xlu0 %v1226_v25, %s1399_s21 }
 0x129   : > { %1262 = vrot.lane.b32.xlu1 %v1221_v26, %s1399_s21  ;;  %s1114_s21 = sshll.u32 %s1466_s28, 8  ;;  %s975_s28 = scalar_lea.sflag [#allocation4], %s1550_s8 }
 0x12a   : > { %s2024_s20 = scalar_lea.hbm %s2075_s7, %s1114_s21 }
 0x12c   : > { %1277 = vrot.lane.b32.xlu0 %v1226_v25, %s1400_s9 }
 0x12d   : > { %1272 = vrot.lane.b32.xlu1 %v1221_v26, %s1400_s9  ;;  %s294_s9 = scalar_lea.vmem [#allocation5], %s1066_s11 }
 0x130   : > { %1287 = vrot.lane.b32.xlu0 %v1226_v25, %s1401_s16  ;;  %v2120_v25 = vmov 0 }
 0x131   : > { %1282 = vrot.lane.b32.xlu1 %v1221_v26, %s1401_s16  ;;  %v2121_v25 = vsel %vm1719_vm11, 4294967295, %v2120_v25  ;;  %v668_v26 = vrot.slane %v652_v63, %v1620_v34  ;;  %vm1735_vm11 = vcmp.eq.s32.totalorder %v626_v7, 1  ;;  %v707_v7 = vrot.slane %v1787_v54, %v1620_v34  ;;  %s989_s16 = sshll.u32 %s294_s9, 4  ;;  %s2026_s16 = int_to_ptr.vmem [resolvable:$true] %s989_s16 }
 0x132   : > { %v2123_v41 = vsel %vm1735_vm11, 4294967295, %v2122_v41  ;;  %vm2132_vm11 = vcmp.lt.s32.totalorder %v1626_v37, 16  ;;  %s1324_s11 = scalar_lea.vmem %s2026_s16, 256  ;;  %p1331_p7 = scmp.lt.s32.totalorder %s2026_s16, %s1329_s29 }
 0x133   : > { %p1325_p6 = scmp.ne.s32.totalorder %s2026_s16, %s1324_s11  ;;  %p1332_p10 = scmp.lt.s32.totalorder %s1330_s17, %s1324_s11 }
 0x134   : > { %756 = vrot.lane.b32.xlu0 %v1588_v23, %s1402_s23 }
 0x135   : > { %754 = vrot.lane.b32.xlu1 %v1584_v21, %s1402_s23  ;;  %p1326_p12 = pnand %p1325_p6, %p2204_p11  ;;  %p1333_p2 = por %p1332_p10, %p1331_p7 }
 0x137   : > { %p1327_p13 = pneg %p1326_p12 }
 0x138   : > { %760 = vrot.lane.b32.xlu0 %v1590_v24, %s1402_s23 }
 0x139   : > { %758 = vrot.lane.b32.xlu1 %v1586_v22, %s1402_s23  ;;  %p1334_p4 = pnand %p1333_p2, %p1327_p13 }
 0x13d   : > { %797 = vperm.xlu1 %1291, %v794_v27   ;;  %v656_v27 = vrot.slane %v652_v63, %v1624_v36 }
 0x13f   : > { %vm1803_vm3 = vcmp.eq.s32.totalorder %v656_v27, 1 }
 0x18a   : > { %v1223_v59 = vpop.permute.xlu0 %1222 }
 0x18b   : > { %v1228_v58 = vpop.permute.xlu1 %1227  ;;  %v1225_v10 = vunpack.i.h.bf16 %v1223_v59  ;;  %v1224_v11 = vunpack.i.l.bf16 %v1223_v59 }
 0x18c   : > { %v1230_v8 = vunpack.i.h.bf16 %v1228_v58  ;;  %v1229_v9 = vunpack.i.l.bf16 %v1228_v58 }
 0x18d   : > { %v496_v44 = vsel %vm2126_vm5, %v1224_v11, %v1225_v10 }
 0x18e   : > { %v1238_v19 = vpop.permute.xlu0 %1237  ;;  %v494_v42 = vsel %vm2124_vm6, %v1229_v9, %v1230_v8  ;;  %v495_v43 = vsel %vm2125_vm12, %v1225_v10, %v1229_v9  ;;  %v497_v45 = vsel %vm2127_vm9, %v1230_v8, %v1224_v11  ;;  %vm2133_vm6 = vmmov %vm2132_vm11  ;;  %v2143_v10 = vmov 0 }
 0x18f   : > { %v1233_v18 = vpop.permute.xlu1 %1232  ;;  %v1240_v38 = vunpack.i.h.bf16 %v1238_v19  ;;  %v1239_v40 = vunpack.i.l.bf16 %v1238_v19  ;;  %vm2134_vm12 = vmmov %vm2133_vm6  ;;  %v2144_v10 = vsel %vm1803_vm3, 4294967295, %v2143_v10  ;;  %v699_v11 = vrot.slane %v1787_v54, %v1617_v32 }
 0x190   : > { %v1235_v33 = vunpack.i.h.bf16 %v1233_v18  ;;  %v1234_v35 = vunpack.i.l.bf16 %v1233_v18  ;;  %vm2135_vm5 = vmmov %vm2133_vm6  ;;  %v741_v18 = vrot.slane %v1729_v31, %v1629_v39 }
 0x191   : > { %v533_v53 = vsel %vm2134_vm12, %v1239_v40, %v1240_v38  ;;  %vm1140_vm9 = vmpackc.low %vm1660_vm0, %vm1656_vm15  ;;  %vm1780_vm12 = vcmp.eq.s32.totalorder %v660_v17, 1  ;;  %v733_v17 = vrot.slane %v1729_v31, %v1624_v36  ;;  %vm2149_vm0 = vcmp.lt.s32.totalorder %v1626_v37, 15 }
 0x192   : > { %v535_v48 = vsel %vm2132_vm11, %v1234_v35, %v1235_v33  ;;  %v536_v49 = vsel %vm2133_vm6, %v1240_v38, %v1234_v35  ;;  %v534_v55 = vsel %vm2135_vm5, %v1235_v33, %v1239_v40  ;;  %v1139_v58 = vpack.c.bf16 %v533_v53, %v494_v42  ;;  %v1248_v62 = vpop.permute.xlu0 %1247  ;;  %vm1119_vm11 = vmpackc.low %vm1674_vm2, %vm1665_vm1 }
 0x193   : > { %v1115_v56 = vpack.c.bf16 %v535_v48, %v496_v44  ;;  %v1118_v57 = vpack.c.bf16 %v536_v49, %v497_v45  ;;  %v1142_v59 = vpack.c.bf16 %v534_v55, %v495_v43  ;;  %v1243_v61 = vpop.permute.xlu1 %1242  ;;  %vm1776_vm6 = vcmp.eq.s32.totalorder %v588_v16, 1  ;;  %vm2140_vm1 = vmpackc.low %vm1652_vm14, %vm1646_vm13 }
 0x194   : > { %v1245_v60 = vunpack.i.h.bf16 %v1243_v61  ;;  %v1244_v8 = vunpack.i.l.bf16 %v1243_v61  ;;  %v1250_v9 = vunpack.i.h.bf16 %v1248_v62  ;;  %v1249_v0 = vunpack.i.l.bf16 %v1248_v62  ;;  %1141 = vmatprep.subr.msk.bf16.mxu1 %vm1140_vm9, %v1139_v58  ;;  %vm2150_vm10 = vmmov %vm2149_vm0  ;;  %v793_v62 = vld [vmem:[%s2071_s3] sm:$0xf] }
 0x195   : > { %1117 = vmatprep.subr.msk.bf16.mxu0 %vm2140_vm1, %v1115_v56  ;;  %vm1799_vm2 = vcmp.eq.s32.totalorder %v668_v26, 1  ;;  %1144 = vmatpush1.bf16.msk.msra.mxu1 %vm1143_vm8, %v1142_v59  ;;  %v745_v16 = vrot.slane %v1729_v31, %v1620_v34  ;;  %vm2147_vm13 = vnez %v2113_v13  ;;  %vm2148_vm14 = vnez %v2111_v12  ;;  %vm2151_vm5 = vmmov %vm2149_vm0 }
 0x196   : > { %1120 = vmatpush1.bf16.msk.msra.mxu0 %vm1119_vm11, %v1118_v57  ;;  %v1258_v52 = vpop.permute.xlu0 %1257  ;;  %v573_v33 = vsel %vm2149_vm0, %v1244_v8, %v1245_v60  ;;  %v574_v35 = vsel %vm2150_vm10, %v1250_v9, %v1244_v8  ;;  %v571_v38 = vsel %vm2151_vm5, %v1249_v0, %v1250_v9  ;;  %vm2152_vm9 = vmmov %vm2149_vm0  ;;  %vm2153_vm11 = vnez %v2115_v14 }
 0x197   : > { %v1253_v51 = vpop.permute.xlu1 %1252  ;;  %v1260_v27 = vunpack.i.h.bf16 %v1258_v52  ;;  %v1259_v30 = vunpack.i.l.bf16 %v1258_v52  ;;  %v572_v40 = vsel %vm2152_vm9, %v1245_v60, %v1249_v0  ;;  %vm2154_vm8 = vnez %v2117_v15  ;;  %vm2156_vm15 = vmmov %vm2155_vm7 }
 0x198   : > { %v1255_v19 = vunpack.i.h.bf16 %v1253_v51  ;;  %v1254_v26 = vunpack.i.l.bf16 %v1253_v51  ;;  %vm1146_vm1 = vmpackc.low %vm2154_vm8, %vm2153_vm11  ;;  %vm2159_vm5 = vnez %v2119_v20  ;;  %vm2160_vm9 = vnez %v2121_v25 }
 0x199   : > { %vm2157_vm0 = vmmov %vm2155_vm7  ;;  %v695_v12 = vrot.slane %v1787_v54, %v1624_v36  ;;  %v703_v13 = vrot.slane %v1787_v54, %v1629_v39 }
 0x19a   : > { %v612_v42 = vsel %vm2155_vm7, %v1254_v26, %v1255_v19  ;;  %v613_v43 = vsel %vm2156_vm15, %v1260_v27, %v1254_v26  ;;  %v610_v44 = vsel %vm2157_vm0, %v1259_v30, %v1260_v27  ;;  %vm2158_vm10 = vmmov %vm2157_vm0  ;;  %v1268_v56 = vpop.permute.xlu0 %1267  ;;  %vm2161_vm7 = vnez %v2123_v41 }
 0x19b   : > { %v611_v45 = vsel %vm2158_vm10, %v1255_v19, %v1259_v30  ;;  %v1121_v46 = vpack.c.bf16 %v612_v42, %v573_v33  ;;  %v1124_v48 = vpack.c.bf16 %v613_v43, %v574_v35  ;;  %v1145_v49 = vpack.c.bf16 %v610_v44, %v571_v38  ;;  %v1263_v55 = vpop.permute.xlu1 %1262  ;;  %vm1149_vm15 = vmpackc.low %vm2161_vm7, %vm1776_vm6 }
 0x19c   : > { %v1148_v53 = vpack.c.bf16 %v611_v45, %v572_v40  ;;  %v1265_v57 = vunpack.i.h.bf16 %v1263_v55  ;;  %v1264_v58 = vunpack.i.l.bf16 %v1263_v55  ;;  %v1270_v59 = vunpack.i.h.bf16 %v1268_v56  ;;  %vm2164_vm4 = vmpackc.low %vm2148_vm14, %vm2147_vm13 }
 0x19d   : > { %v1269_v61 = vunpack.i.l.bf16 %v1268_v56  ;;  %vm1403_vm10 = vmmov 1   ;;  %1123 = vmatprep.subr.msk.bf16.mxu0 %vm2164_vm4, %v1121_v46  ;;  %1147 = vmatprep.subr.msk.bf16.mxu1 %vm1146_vm1, %v1145_v49  ;;  %vm1872_vm0 = vcmp.eq.s32.totalorder %v737_v47, 1  ;;  %vm2168_vm4 = vcmp.le.s32.totalorder %v1611_v29, 14 }
 0x19e   : > { %vm1858_vm3 = vmpackc.low %vm1780_vm12, %vm1403_vm10  ;;  %vm2167_vm12 = vcmp.le.s32.totalorder %v1606_v28, 14  ;;  %vm2171_vm14 = vcmp.lt.s32.totalorder %v1626_v37, 127  ;;  %1150 = vmatpush1.bf16.msk.msra.mxu1 %vm1149_vm15, %v1148_v53  ;;  %v1278_v25 = vpop.permute.xlu0 %1277  ;;  %vm1937_vm6 = vcmp.eq.s32.totalorder %v733_v17, 1  ;;  %vm1948_vm7 = vcmp.eq.s32.totalorder %v707_v7, 1 }
 0x19f   : > { %vm1886_vm13 = vmand %vm2168_vm4, %vm2167_vm12  ;;  %v650_v15 = vsel %vm2171_vm14, %v1264_v58, %v1265_v57  ;;  %v1273_v20 = vpop.permute.xlu1 %1272  ;;  %vm1952_vm15 = vcmp.eq.s32.totalorder %v695_v12, 1 }
 0x1a0   : > { %vm2172_vm11 = vmmov %vm2171_vm14  ;;  %v1130_v29 = vpack.c.bf16 %v650_v15, %v1584_v21  ;;  %v768_v41 = vsel %vm1886_vm13, 1, %v1394_v1  ;;  %v1275_v63 = vunpack.i.h.bf16 %v1273_v20  ;;  %v1274_v6 = vunpack.i.l.bf16 %v1273_v20 }
 0x1a1   : > { %v651_v8 = vsel %vm2172_vm11, %v1270_v59, %v1264_v58  ;;  %vm2173_vm8 = vmmov %vm2172_vm11  ;;  %vm1929_vm11 = vcmp.eq.s32.totalorder %v699_v11, 1  ;;  %v776_v26 = vrot.slane %v768_v41, %v1617_v32  ;;  %v784_v27 = vrot.slane %v768_v41, %v1620_v34 }
 0x1a2   : > { %v648_v9 = vsel %vm2173_vm8, %v1269_v61, %v1270_v59  ;;  %vm2174_vm1 = vmmov %vm2173_vm8  ;;  %v1151_v0 = vpack.c.bf16 %v651_v8, %v1590_v24  ;;  %vm1933_vm8 = vcmp.eq.s32.totalorder %v745_v16, 1  ;;  %v1288_v19 = vpop.permute.xlu0 %1287  ;;  %v772_v30 = vrot.slane %v768_v41, %v1624_v36 }
 0x1a3   : > { %v649_v54 = vsel %vm2174_vm1, %v1265_v57, %v1269_v61  ;;  %vm2175_vm12 = vmpackc.low %vm2160_vm9, %vm2159_vm5  ;;  %v1154_v51 = vpack.c.bf16 %v648_v9, %v1586_v22  ;;  %vm2179_vm9 = vnez %v2146_v50  ;;  %v1279_v50 = vunpack.i.l.bf16 %v1278_v25  ;;  %v1283_v17 = vpop.permute.xlu1 %1282 }
 0x1a4   : > { %1126 = vmatpush1.bf16.msk.msra.mxu0 %vm2175_vm12, %v1124_v48  ;;  %vm1906_vm4 = vmpackc.low %vm1799_vm2, %vm1403_vm10  ;;  %v1127_v47 = vpack.c.bf16 %v649_v54, %v1588_v23  ;;  %vm2178_vm2 = vnez %v2144_v10  ;;  %v1280_v10 = vunpack.i.h.bf16 %v1278_v25  ;;  %v780_v33 = vrot.slane %v768_v41, %v1629_v39 }
 0x1a5   : > { %vm1131_vm5 = vmpackc.low %vm2178_vm2, %vm1403_vm10  ;;  %1153 = vmatprep.subr.msk.bf16.mxu1 %vm1906_vm4, %v1151_v0  ;;  %v1285_v35 = vunpack.i.h.bf16 %v1283_v17  ;;  %v1284_v38 = vunpack.i.l.bf16 %v1283_v17  ;;  %v1290_v31 = vunpack.i.h.bf16 %v1288_v19  ;;  %vm2196_vm1 = vcmp.lt.s32.totalorder %v1626_v37, 113 }
 0x1a6   : > { %vm1925_vm14 = vmpackc.low %vm2179_vm9, %vm1403_vm10  ;;  %1129 = vmatprep.subr.msk.bf16.mxu0 %vm1858_vm3, %v1127_v47  ;;  %vm1956_vm10 = vcmp.eq.s32.totalorder %v703_v13, 1  ;;  %vm1963_vm3 = vcmp.eq.s32.totalorder %v741_v18, 1  ;;  %v1289_v18 = vunpack.i.l.bf16 %v1288_v19  ;;  %v688_v40 = vsel %vm2196_vm1, %v1274_v6, %v1275_v63  ;;  %v757_v55 = vpop.permute.xlu0 %756 }
 0x1a7   : > { %1156 = vmatpush1.bf16.msk.msra.mxu1 %vm1925_vm14, %v1154_v51  ;;  %vm1134_vm13 = vmpackc.low %vm1872_vm0, %vm1929_vm11  ;;  %vm2200_vm9 = vcmp.lt.s32.totalorder %v1626_v37, 112  ;;  %v755_v53 = vpop.permute.xlu1 %754  ;;  %vm800_vm0 = vcmask 588800  }
 0x1a8   : > { %1132 = vmatpush1.bf16.msk.msra.mxu0 %vm1131_vm5, %v1130_v29  ;;  %vm2197_vm12 = vmmov %vm2196_vm1  ;;  %v727_v39 = vsel %vm2200_vm9, %v1284_v38, %v1285_v35 }
 0x1a9   : > { %v689_v32 = vsel %vm2197_vm12, %v1280_v10, %v1274_v6  ;;  %vm2198_vm4 = vmmov %vm2196_vm1  ;;  %v1136_v45 = vpack.c.bf16 %v727_v39, %v688_v40 }
 0x1aa   : > { %v686_v34 = vsel %vm2198_vm4, %v1279_v50, %v1280_v10  ;;  %vm2199_vm2 = vmmov %vm2196_vm1  ;;  %v761_v57 = vpop.permute.xlu0 %760 }
 0x1ab   : > { %v687_v36 = vsel %vm2199_vm2, %v1275_v63, %v1279_v50  ;;  %vm1158_vm5 = vmpackc.low %vm1933_vm8, %vm1948_vm7  ;;  %vm786_vm7 = vcmp.eq.s32.totalorder %v776_v26, 1  ;;  %v759_v56 = vpop.permute.xlu1 %758  ;;  %vm785_vm2 = vcmp.eq.s32.totalorder %v772_v30, 1 }
 0x1ac   : > { %vm2201_vm14 = vmmov %vm2200_vm9 }
 0x1ad   : > { %v728_v42 = vsel %vm2201_vm14, %v1290_v31, %v1284_v38  ;;  %vm2202_vm1 = vmmov %vm2200_vm9  ;;  %vm787_vm9 = vcmp.eq.s32.totalorder %v780_v33, 1 }
 0x1ae   : > { %v725_v43 = vsel %vm2202_vm1, %v1289_v18, %v1290_v31  ;;  %vm2203_vm12 = vmmov %vm2202_vm1  ;;  %v1157_v48 = vpack.c.bf16 %v728_v42, %v689_v32 }
 0x1af   : > { %v726_v44 = vsel %vm2203_vm12, %v1285_v35, %v1289_v18  ;;  %vm1137_vm4 = vmpackc.low %vm1937_vm6, %vm1952_vm15  ;;  %v1160_v49 = vpack.c.bf16 %v725_v43, %v686_v34  ;;  %vm762_vm6 = vcmp.lt.s32.totalorder %v1626_v37, 111  ;;  %vm788_vm15 = vcmp.eq.s32.totalorder %v784_v27, 1 }
 0x1b0   : > { %v1133_v46 = vpack.c.bf16 %v726_v44, %v687_v36  ;;  %vm1161_vm8 = vmpackc.low %vm1963_vm3, %vm1956_vm10  ;;  %1159 = vmatprep.subr.msk.bf16.mxu1 %vm1158_vm5, %v1157_v48  ;;  %v764_v58 = vsel %vm762_vm6, %v757_v55, %v759_v56  ;;  %v763_v59 = vsel %vm762_vm6, %v759_v56, %v761_v57  ;;  %v766_v61 = vsel %vm762_vm6, %v761_v57, %v755_v53 }
 0x1b1   : > { %1162 = vmatpush1.bf16.msk.msra.mxu1 %vm1161_vm8, %v1160_v49  ;;  %v765_v60 = vsel %vm762_vm6, %v755_v53, %v757_v55 }
 0x1b2   : > { %1135 = vmatprep.subr.msk.bf16.mxu0 %vm1134_vm13, %v1133_v46  ;;  %1105 = vmatprep.subr.msk.mxu1 %vm788_vm15, %v766_v61 }
 0x1b3   : > { %1138 = vmatpush1.bf16.msk.msra.mxu0 %vm1137_vm4, %v1136_v45 }
 0x1b4   : > { %1088 = vmatprep.subr.msk.mxu0 %vm786_vm7, %v764_v58 }
 0x1b5   : > { %1106 = vmatpush1.msk.msra.mxu1 %vm787_vm9, %v763_v59 }
 0x1b6   : > { %1107 = vmatmul.mubr.msk.f32.vlgmr.msra.gmra.mrb[2].mxu1 %vm800_vm0, %v793_v62 }
 0x1b7   : > { %1089 = vmatpush1.msk.msra.mxu0 %vm785_vm2, %v765_v60 }
 0x1b8   : > { %1090 = vmatmul.mubr.msk.f32.vlgmr.msra.gmra.mrb[2].mxu0 %vm800_vm0, %v793_v62 }
 0x1bc   : > { %v798_v37 = vpop.permute.xlu1 %797 }
 0x289   : > { %v941_v12 = vpop.f32.mrb[2].mxu1 }
 0x28a   : > { %v942_v14 = vadd.f32 %v941_v12, %v798_v37  ;;  %v943_v8 = vpop.f32.mrb[3].mxu1 }
 0x28b   : > { %v870_v7 = vpop.f32.mrb[2].mxu0  ;;  %v944_v54 = vadd.f32 %v943_v8, %v798_v37 }
 0x28c   : > { %v871_v13 = vadd.f32 %v870_v7, %v798_v37  ;;  %v872_v15 = vpop.f32.mrb[3].mxu0  ;;  %vm948_vm10 = vcmp.gt.f32.partialorder %v942_v14, 0.0  ;;  %v952_v29 = vmul.f32 0.1, %v942_v14 }
 0x28d   : > { %v873_v9 = vadd.f32 %v872_v15, %v798_v37  ;;  %vm949_vm13 = vcmp.gt.f32.partialorder %v944_v54, 0.0  ;;  %v953_v47 = vmul.f32 0.1, %v944_v54 }
 0x28e   : > { %vm946_vm11 = vcmp.gt.f32.partialorder %v871_v13, 0.0  ;;  %v950_v28 = vmul.f32 0.1, %v871_v13  ;;  %v956_v20 = vsel %vm948_vm10, %v942_v14, %v952_v29 }
 0x28f   : > { %vm947_vm3 = vcmp.gt.f32.partialorder %v873_v9, 0.0  ;;  %v951_v0 = vmul.f32 0.1, %v873_v9  ;;  %v962_v21 = vadd.f32 %v956_v20, %v1564_v3  ;;  %v957_v23 = vsel %vm949_vm13, %v944_v54, %v953_v47 }
 0x290   : > { %v954_v51 = vsel %vm946_vm11, %v871_v13, %v950_v28  ;;  %v963_v41 = vadd.f32 %v957_v23, %v1572_v5 }
 0x291   : > { %v960_v25 = vadd.f32 %v954_v51, %v1562_v2  ;;  %v955_v22 = vsel %vm947_vm3, %v873_v9, %v951_v0 }
 0x292   : > { %v961_v24 = vadd.f32 %v955_v22, %v1568_v4  ;;  %v969_v6 = vcombine.low %v962_v21, %v963_v41 }
 0x294   : > { %v968_v63 = vcombine.low %v960_v25, %v961_v24  ;;  %973 = vst [vmem:[%s294_s9 + $0x8] sm:$0xff] %v969_v6 }
 0x296   : > { %972 = vst [vmem:[%s294_s9] sm:$0xff] %v968_v63 }
 0x297   : > { %1337 = shalt.err (!%p1334_p4)
}
 0x298   : > { %s1338_s8 = scalar_lea.hbm %s2024_s20, 256  ;;  %s1342_s19 = scalar_lea.hbm %s2075_s7, 512 }
 0x299   : > { %p1339_p5 = scmp.ne.s32.totalorder %s2024_s20, %s1338_s8  ;;  %p1343_p0 = scmp.lt.u32.totalorder %s2024_s20, %s2075_s7 }
 0x29a   : > { %p1344_p1 = scmp.lt.u32.totalorder %s1342_s19, %s1338_s8  ;;  %p1346_p6 = scmp.lt.u32.totalorder %s1338_s8, %s2024_s20 }
 0x29b   : > { %p1340_p8 = pnand %p1339_p5, %p2204_p11 }
 0x29c   : > { %p1345_p3 = por %p1344_p1, %p1343_p0 }
 0x29d   : > { %p1341_p9 = pneg %p1340_p8 }
 0x29e   : > { %p1347_p12 = por %p1346_p6, %p1345_p3 }
 0x2a0   : > { %p1348_p13 = pnand %p1347_p12, %p1341_p9 }
 0x2a2   : > { %1351 = shalt.err (!%p1348_p13)
}
 0x2a3   : > { %1165 = dma.vmem_to_hbm [thread:$0]  (%p2204_p11), %s2026_s16, 256, %s2024_s20, %s975_s28  }
 0x2a4 PF: > { %s1001_s23 = sand.u32 1, %s1378_s24   ;;  %p2205_p7 = scmp.ne.s32.totalorder %s2090_s14, 0 }
 0x2a5   : > { %p2206_p10 = scmp.ge.s32.totalorder %s1390_s27, 2  ;;  %s1002_s12 = scalar_lea.sflag [#allocation4], %s1001_s23 }
 0x2a7   : > { %p1172_p2 = pnand %p2206_p10, %p2205_p7 }
 0x2a9   : > { %1373 = dma.done.wait (!%p1172_p2), %s1002_s12, 256  }
 0x2aa   : > { %1375 = vsyncadd (!%p1172_p2), %s1002_s12, 4294967040  ;;  %p20_p4 = scmp.ge.s32.totalorder %s1470_s30, 4   ;;  %s2207_s24 = smov %s1382_s25 }
 0x2ab   : > { %s2208_s25 = smov %s1386_s26  ;;  %s2209_s26 = smov %s1482_s10 }
 0x2ac   : > { %s2210_s27 = smov %s1470_s30  ;;  %22 = sbr.rel (!%p20_p4) target bundleno = 5 (0x5), region = 93 }
 0x2b3   :  { %1007 = vsyncpa [#allocation3], 1 }
 0x2b4   :  { %1009 = vsyncpa [#allocation3 + $0x1], 1 }
 0x2b5   :  { %1010 = vsyncpa [#allocation4], 1 }
 0x2b6   :  { %1012 = vsyncpa [#allocation4 + $0x1], 1 }

</bundles_post_ra>
